<compile_context>
chip_gen: v7x
topology: tpu7x:2x2x1
jax: 0.10.0
libtpu: 0.0.40
codegen_flags: <defaults>
</compile_context>

<pallas_src>
import jax
import jax.numpy as jnp
from jax.experimental import pallas as pl
from jax.experimental.pallas import tpu as pltpu


# ----------------------------------------------------------------------------
# Tiling helpers
# ----------------------------------------------------------------------------
def _choose_tm(M):
    """Largest row tile (<=512) that still yields >=2 grid steps; else 8."""
    for tm in (512, 256, 128, 64, 32, 16, 8):
        if M >= 2 * tm:
            return tm
    return 8


def _vmem_limit_bytes(tm, k, n_out_total):
    # Double-buffered x tile (bf16) + double-buffered f32 outputs + resident
    # bf16 weights (assume double-buffered to be safe) + biases + headroom.
    need = (2 * (tm * k * 2 + tm * n_out_total * 4)
            + 2 * (k * n_out_total * 2)
            + n_out_total * 4)
    limit = max(2 * need, 32 * 1024 * 1024)
    return int(min(limit, 64 * 1024 * 1024))   # stay inside v7x physical VMEM


# ----------------------------------------------------------------------------
# Pallas kernels
# ----------------------------------------------------------------------------
def _qkv_kernel(x_ref, wq_ref, wkv_ref, bq_ref, bkv_ref, q_ref, kv_ref):
    """x: [TM, K] bf16; wq: [K, Nq] bf16; wkv: [K, Nkv] bf16; biases f32."""
    x = x_ref[...]
    q_acc = jnp.dot(x, wq_ref[...], preferred_element_type=jnp.float32)
    kv_acc = jnp.dot(x, wkv_ref[...], preferred_element_type=jnp.float32)
    q_ref[...] = (q_acc + bq_ref[...]).astype(q_ref.dtype)
    kv_ref[...] = (kv_acc + bkv_ref[...]).astype(kv_ref.dtype)


def _linear_kernel(x_ref, w_ref, b_ref, o_ref):
    acc = jnp.dot(x_ref[...], w_ref[...], preferred_element_type=jnp.float32)
    o_ref[...] = (acc + b_ref[...]).astype(o_ref.dtype)


# ----------------------------------------------------------------------------
# Wrappers
# ----------------------------------------------------------------------------
def qkv_projection_pallas(x2d_bf16, wq_t, wkv_t, bq2d, bkv2d):
    """x2d: (M, K) bf16; wq_t: (K, Nq) bf16; wkv_t: (K, Nkv) bf16.
    Returns (q: (M, Nq) f32, kv: (M, Nkv) f32)."""
    M, K = x2d_bf16.shape
    Nq = wq_t.shape[1]
    Nkv = wkv_t.shape[1]

    TM = _choose_tm(M)
    Mp = pl.cdiv(M, TM) * TM
    if Mp != M:
        x2d_bf16 = jnp.pad(x2d_bf16, ((0, Mp - M), (0, 0)))

    cost = pl.CostEstimate(
        flops=2 * Mp * K * (Nq + Nkv),
        transcendentals=0,
        bytes_accessed=(Mp * K * 2 + K * (Nq + Nkv) * 2
                        + (Nq + Nkv) * 4 + Mp * (Nq + Nkv) * 4),
    )

    q, kv = pl.pallas_call(
        _qkv_kernel,
        out_shape=(jax.ShapeDtypeStruct((Mp, Nq), jnp.float32),
                   jax.ShapeDtypeStruct((Mp, Nkv), jnp.float32)),
        grid_spec=pltpu.PrefetchScalarGridSpec(
            num_scalar_prefetch=0,
            grid=(Mp // TM,),
            in_specs=[
                pl.BlockSpec((TM, K), lambda i: (i, 0)),     # x tile
                pl.BlockSpec((K, Nq), lambda i: (0, 0)),     # wq (resident)
                pl.BlockSpec((K, Nkv), lambda i: (0, 0)),    # wkv (resident)
                pl.BlockSpec((1, Nq), lambda i: (0, 0)),     # bq
                pl.BlockSpec((1, Nkv), lambda i: (0, 0)),    # bkv
            ],
            out_specs=[
                pl.BlockSpec((TM, Nq), lambda i: (i, 0)),
                pl.BlockSpec((TM, Nkv), lambda i: (i, 0)),
            ],
        ),
        compiler_params=pltpu.CompilerParams(
            dimension_semantics=("parallel",),
            vmem_limit_bytes=_vmem_limit_bytes(TM, K, Nq + Nkv)),
        cost_estimate=cost,
    )(x2d_bf16, wq_t, wkv_t, bq2d, bkv2d)
    return q[:M], kv[:M]


def linear_pallas(x2d_bf16, w_t, b2d):
    """x2d: (M, K) bf16; w_t: (K, Nout) bf16; b2d: (1, Nout) f32 -> (M, Nout) f32."""
    M, K = x2d_bf16.shape
    Nout = w_t.shape[1]

    TM = _choose_tm(M)
    Mp = pl.cdiv(M, TM) * TM
    if Mp != M:
        x2d_bf16 = jnp.pad(x2d_bf16, ((0, Mp - M), (0, 0)))

    cost = pl.CostEstimate(
        flops=2 * Mp * K * Nout,
        transcendentals=0,
        bytes_accessed=Mp * K * 2 + K * Nout * 2 + Nout * 4 + Mp * Nout * 4,
    )

    y = pl.pallas_call(
        _linear_kernel,
        out_shape=jax.ShapeDtypeStruct((Mp, Nout), jnp.float32),
        grid_spec=pltpu.PrefetchScalarGridSpec(
            num_scalar_prefetch=0,
            grid=(Mp // TM,),
            in_specs=[
                pl.BlockSpec((TM, K), lambda i: (i, 0)),
                pl.BlockSpec((K, Nout), lambda i: (0, 0)),
                pl.BlockSpec((1, Nout), lambda i: (0, 0)),
            ],
            out_specs=pl.BlockSpec((TM, Nout), lambda i: (i, 0)),
        ),
        compiler_params=pltpu.CompilerParams(
            dimension_semantics=("parallel",),
            vmem_limit_bytes=_vmem_limit_bytes(TM, K, Nout)),
        cost_estimate=cost,
    )(x2d_bf16, w_t, b2d)
    return y[:M]


# ----------------------------------------------------------------------------
# Parameter init (deterministic, mimics nn.Linear's U(-1/sqrt(fan_in), ...))
# Weights are pre-transposed and pre-cast to bf16 once, here.
# ----------------------------------------------------------------------------
def init_linear_projection_params(key, dim, heads=8, dim_head=64, bias=True):
    inner_dim = dim_head * heads
    ks = jax.random.split(key, 6)

    def lin(kw, kb, out_f, in_f):
        bound = 1.0 / (in_f ** 0.5)
        w = jax.random.uniform(kw, (out_f, in_f), jnp.float32, -bound, bound)
        b = (jax.random.uniform(kb, (out_f,), jnp.float32, -bound, bound)
             if bias else jnp.zeros((out_f,), jnp.float32))
        return w, b

    wq, bq = lin(ks[0], ks[1], inner_dim, dim)              # to_q
    wkvq, bkvq = lin(ks[2], ks[3], inner_dim * 2, dim)      # to_kv_from_q
    wkv, bkv = lin(ks[4], ks[5], inner_dim * 2, dim * 2)    # to_kv

    return dict(
        heads=heads, dim=dim, inner_dim=inner_dim,
        # f32 transposed copies (reference / debugging)
        wq_t=wq.T, bq=bq,
        wkv_from_q_t=wkvq.T, bkv_from_q=bkvq,
        wkv_t=wkv.T, bkv=bkv,
        # bf16, pre-transposed weights for the MXU
        wq_t_bf16=wq.T.astype(jnp.bfloat16),
        wkv_from_q_t_bf16=wkvq.T.astype(jnp.bfloat16),
        wkv_t_bf16=wkv.T.astype(jnp.bfloat16),
        # biases as (1, Nout) f32 for broadcast-add inside the kernel
        bq_2d=bq.reshape(1, -1),
        bkv_from_q_2d=bkvq.reshape(1, -1),
        bkv_2d=bkv.reshape(1, -1),
    )


# ----------------------------------------------------------------------------
# Forward pass (matches LinearProjection.forward)
# ----------------------------------------------------------------------------
def linear_projection_forward(params, x, attn_kv=None):
    B, N, C = x.shape
    heads = params["heads"]
    inner = params["inner_dim"]
    assert C % heads == 0, "C must be divisible by heads"
    # The PyTorch module reshapes with C // heads, which implicitly assumes
    # heads * dim_head == C (inner_dim == C).
    assert inner == C, "LinearProjection assumes heads * dim_head == C"
    dh = C // heads

    x2d = x.reshape(B * N, C).astype(jnp.bfloat16)

    if attn_kv is None:
        q2d, kv2d = qkv_projection_pallas(
            x2d,
            params["wq_t_bf16"], params["wkv_from_q_t_bf16"],
            params["bq_2d"], params["bkv_from_q_2d"])
        N_kv = N
    else:
        N_kv = attn_kv.shape[1]
        assert attn_kv.shape[-1] == 2 * params["dim"], \
            "attn_kv last dim must be 2*dim for to_kv"
        q2d = linear_pallas(x2d, params["wq_t_bf16"], params["bq_2d"])
        kv2d = linear_pallas(
            attn_kv.reshape(B * N_kv, attn_kv.shape[-1]).astype(jnp.bfloat16),
            params["wkv_t_bf16"], params["bkv_2d"])

    # q: (B*N, inner) -> (B, N, heads, dh) -> (B, heads, N, dh)
    q = q2d.reshape(B, N, heads, dh).transpose(0, 2, 1, 3)
    # kv: (B*N_kv, 2*inner) -> (B, N_kv, 2, heads, dh) -> (2, B, heads, N_kv, dh)
    kv = kv2d.reshape(B, N_kv, 2, heads, dh).transpose(2, 0, 3, 1, 4)
    return q, kv[0], kv[1]


# ----------------------------------------------------------------------------
# Plain-JAX references (f32) for sanity checks
# ----------------------------------------------------------------------------
def _reference_forward(params, x):
    B, N, C = x.shape
    heads = params["heads"]
    dh = C // heads
    x2d = x.reshape(B * N, C)
    q2d = x2d @ params["wq_t"] + params["bq"]
    kv2d = x2d @ params["wkv_from_q_t"] + params["bkv_from_q"]
    q = q2d.reshape(B, N, heads, dh).transpose(0, 2, 1, 3)
    kv = kv2d.reshape(B, N, 2, heads, dh).transpose(2, 0, 3, 1, 4)
    return q, kv[0], kv[1]


def _reference_forward_kv(params, x, attn_kv):
    B, N, C = x.shape
    heads = params["heads"]
    dh = C // heads
    N_kv = attn_kv.shape[1]
    q2d = x.reshape(B * N, C) @ params["wq_t"] + params["bq"]
    kv2d = attn_kv.reshape(B * N_kv, -1) @ params["wkv_t"] + params["bkv"]
    q = q2d.reshape(B, N, heads, dh).transpose(0, 2, 1, 3)
    kv = kv2d.reshape(B, N_kv, 2, heads, dh).transpose(2, 0, 3, 1, 4)
    return q, kv[0], kv[1]


if __name__ == "__main__":
    # Small shapes consistent with the module: dim == heads * dim_head so the
    # C // heads reshape in forward() is valid (as the PyTorch code assumes).
    heads, dim_head = 4, 8
    dim = heads * dim_head          # 32
    B, N = 2, 64                    # M = B*N = 128 -> TM = 64, grid = 2

    key = jax.random.PRNGKey(0)
    kp, kx, kkv = jax.random.split(key, 3)
    params = init_linear_projection_params(kp, dim, heads=heads,
                                           dim_head=dim_head, bias=True)
    x = jax.random.normal(kx, (B, N, dim), jnp.float32)
    attn_kv = jax.random.normal(kkv, (B, N, 2 * dim), jnp.float32)

    # --- attn_kv=None path (fused q + kv kernel) ---
    q, k, v = linear_projection_forward(params, x)
    jax.block_until_ready((q, k, v))

    qr, kr, vr = _reference_forward(params, x)
    assert q.shape == (B, heads, N, dim // heads)
    assert k.shape == (B, heads, N, dim // heads)
    assert v.shape == (B, heads, N, dim // heads)
    assert jnp.allclose(q, qr, rtol=1e-2, atol=1e-2)
    assert jnp.allclose(k, kr, rtol=1e-2, atol=1e-2)
    assert jnp.allclose(v, vr, rtol=1e-2, atol=1e-2)

    # --- attn_kv path (separate q / kv kernels) ---
    q2, k2, v2 = linear_projection_forward(params, x, attn_kv=attn_kv)
    jax.block_until_ready((q2, k2, v2))

    qr2, kr2, vr2 = _reference_forward_kv(params, x, attn_kv)
    assert jnp.allclose(q2, qr2, rtol=1e-2, atol=1e-2)
    assert jnp.allclose(k2, kr2, rtol=2e-2, atol=2e-2)
    assert jnp.allclose(v2, vr2, rtol=2e-2, atol=2e-2)

    print("KERNEL_OK")
</pallas_src>

<mosaic_0001>
module attributes {stable_mosaic.version = 11 : i64} {
  func.func @_qkv_kernel(%arg0: i32, %arg1: memref<64x32xbf16, #tpu.memory_space<vmem>>, %arg2: memref<32x32xbf16, #tpu.memory_space<vmem>>, %arg3: memref<32x64xbf16, #tpu.memory_space<vmem>>, %arg4: memref<1x32xf32, #tpu.memory_space<vmem>>, %arg5: memref<1x64xf32, #tpu.memory_space<vmem>>, %arg6: memref<64x32xf32, #tpu.memory_space<vmem>>, %arg7: memref<64x64xf32, #tpu.memory_space<vmem>>) attributes {dimension_semantics = [#tpu.dimension_semantics<parallel>], iteration_bounds = array<i64: 2>, scalar_prefetch = 0 : i64, scratch_operands = 0 : i64, tpu.core_type = #tpu.core_type<tc>, window_params = [{transform_indices = @transform_0, window_bounds = array<i64: 64, 32>}, {pipeline_mode = #tpu.pipeline_mode<synchronous>, transform_indices = @transform_1, window_bounds = array<i64: 32, 32>}, {pipeline_mode = #tpu.pipeline_mode<synchronous>, transform_indices = @transform_2, window_bounds = array<i64: 32, 64>}, {pipeline_mode = #tpu.pipeline_mode<synchronous>, transform_indices = @transform_3, window_bounds = array<i64: 1, 32>}, {pipeline_mode = #tpu.pipeline_mode<synchronous>, transform_indices = @transform_4, window_bounds = array<i64: 1, 64>}, {transform_indices = @transform_5, window_bounds = array<i64: 64, 32>}, {transform_indices = @transform_6, window_bounds = array<i64: 64, 64>}]} {
    %c0 = arith.constant 0 : index
    %c0_0 = arith.constant 0 : index
    %0 = vector.load %arg1[%c0, %c0_0] : memref<64x32xbf16, #tpu.memory_space<vmem>>, vector<64x32xbf16>
    %c0_1 = arith.constant 0 : index
    %c0_2 = arith.constant 0 : index
    %1 = vector.load %arg2[%c0_1, %c0_2] : memref<32x32xbf16, #tpu.memory_space<vmem>>, vector<32x32xbf16>
    %cst = arith.constant dense<0.000000e+00> : vector<64x32xf32>
    %2 = tpu.matmul %0, %1, %cst {dimension_numbers = #tpu.dot_dimension_numbers<[1], [0], [0], [1], [0, 0, 1, 1], [], []>} : vector<64x32xbf16>, vector<32x32xbf16>, vector<64x32xf32> -> vector<64x32xf32>
    %c0_3 = arith.constant 0 : index
    %c0_4 = arith.constant 0 : index
    %3 = vector.load %arg3[%c0_3, %c0_4] : memref<32x64xbf16, #tpu.memory_space<vmem>>, vector<32x64xbf16>
    %cst_5 = arith.constant dense<0.000000e+00> : vector<64x64xf32>
    %4 = tpu.matmul %0, %3, %cst_5 {dimension_numbers = #tpu.dot_dimension_numbers<[1], [0], [0], [1], [0, 0, 1, 1], [], []>} : vector<64x32xbf16>, vector<32x64xbf16>, vector<64x64xf32> -> vector<64x64xf32>
    %c0_6 = arith.constant 0 : index
    %c0_7 = arith.constant 0 : index
    %5 = vector.load %arg4[%c0_6, %c0_7] : memref<1x32xf32, #tpu.memory_space<vmem>>, vector<1x32xf32>
    %6 = vector.broadcast %5 : vector<1x32xf32> to vector<64x32xf32>
    %7 = arith.addf %2, %6 : vector<64x32xf32>
    %c0_8 = arith.constant 0 : index
    %c0_9 = arith.constant 0 : index
    %8 = vector.load %arg6[%c0_8, %c0_9] : memref<64x32xf32, #tpu.memory_space<vmem>>, vector<64x32xf32>
    tpu.vector_store %arg6[%c0_8, %c0_9], %7 {strides = array<i32>} : memref<64x32xf32, #tpu.memory_space<vmem>>, vector<64x32xf32>,
    %c0_10 = arith.constant 0 : index
    %c0_11 = arith.constant 0 : index
    %9 = vector.load %arg5[%c0_10, %c0_11] : memref<1x64xf32, #tpu.memory_space<vmem>>, vector<1x64xf32>
    %10 = vector.broadcast %9 : vector<1x64xf32> to vector<64x64xf32>
    %11 = arith.addf %4, %10 : vector<64x64xf32>
    %c0_12 = arith.constant 0 : index
    %c0_13 = arith.constant 0 : index
    %12 = vector.load %arg7[%c0_12, %c0_13] : memref<64x64xf32, #tpu.memory_space<vmem>>, vector<64x64xf32>
    tpu.vector_store %arg7[%c0_12, %c0_13], %11 {strides = array<i32>} : memref<64x64xf32, #tpu.memory_space<vmem>>, vector<64x64xf32>,
    return
  }
  func.func @transform_0(%arg0: i32) -> (i32, i32) {
    %c0_i32 = arith.constant 0 : i32
    %c0_i32_0 = arith.constant 0 : i32
    return %arg0, %c0_i32 : i32, i32
  }
  func.func @transform_1(%arg0: i32) -> (i32, i32) {
    %c0_i32 = arith.constant 0 : i32
    %c0_i32_0 = arith.constant 0 : i32
    %c0_i32_1 = arith.constant 0 : i32
    return %c0_i32, %c0_i32_0 : i32, i32
  }
  func.func @transform_2(%arg0: i32) -> (i32, i32) {
    %c0_i32 = arith.constant 0 : i32
    %c0_i32_0 = arith.constant 0 : i32
    %c0_i32_1 = arith.constant 0 : i32
    return %c0_i32, %c0_i32_0 : i32, i32
  }
  func.func @transform_3(%arg0: i32) -> (i32, i32) {
    %c0_i32 = arith.constant 0 : i32
    %c0_i32_0 = arith.constant 0 : i32
    %c0_i32_1 = arith.constant 0 : i32
    return %c0_i32, %c0_i32_0 : i32, i32
  }
  func.func @transform_4(%arg0: i32) -> (i32, i32) {
    %c0_i32 = arith.constant 0 : i32
    %c0_i32_0 = arith.constant 0 : i32
    %c0_i32_1 = arith.constant 0 : i32
    return %c0_i32, %c0_i32_0 : i32, i32
  }
  func.func @transform_5(%arg0: i32) -> (i32, i32) {
    %c0_i32 = arith.constant 0 : i32
    %c0_i32_0 = arith.constant 0 : i32
    return %arg0, %c0_i32 : i32, i32
  }
  func.func @transform_6(%arg0: i32) -> (i32, i32) {
    %c0_i32 = arith.constant 0 : i32
    %c0_i32_0 = arith.constant 0 : i32
    return %arg0, %c0_i32 : i32, i32
  }
}

</mosaic_0001>

<bundles_post_ra>
// kernel: tpu_custom_call.1
= control target key start
LH: loop header
LB: loop body
LE: loop exit
PB: predicated region body
PF: predicated region fallthrough
CT: control target
= control target key end

     0   :  { %s720_s21 = smov 0   ;;  %s802_s0 = inlined_call_operand.vmem [shape: bf16[128,32], index: 0, kind: input, shape index: {}]   ;;  %s803_s1 = inlined_call_operand.vmem [shape: bf16[32,32], index: 1, kind: input, shape index: {}]   ;;  %s804_s2 = inlined_call_operand.vmem [shape: bf16[32,64], index: 2, kind: input, shape index: {}]   ;;  %s805_s3 = inlined_call_operand.vmem [shape: f32[1,32], index: 3, kind: input, shape index: {}]   ;;  %s806_s4 = inlined_call_operand.vmem [shape: f32[1,64], index: 4, kind: input, shape index: {}]   ;;  %s807_s5 = inlined_call_operand.vmem [shape: f32[128,32], index: 5, kind: output, shape index: {0}]   ;;  %s808_s6 = inlined_call_operand.vmem [shape: f32[128,64], index: 6, kind: output, shape index: {1}]  }
   0x1 LB: > { %s594_s22 = sadd.s32 4294967295, %s683_s21   ;;  %p598_p0 = scmp.ge.s32.totalorder %s683_s21, 1  ;;  %s683_s21 = sphi %s720_s21, %s17_s21  }
   0x2   : > { %p216_p1 = scmp.lt.s32.totalorder %s683_s21, 3 }
   0x4   : > { %p217_p2 = pnand %p598_p0, %p216_p1 }
   0x5   : > { %v669_v0 = vld [vmem:[%s803_s1] sm:$0xff] (!%p217_p2)   ;;  %s599_s25 = sshll.u32 (!%p217_p2), %s594_s22, 3  ;;  %v671_v2 = vld [vmem:[%s803_s1 + $0x8] sm:$0xff] (!%p217_p2)   ;;  %vm325_vm0 = vcmask (!%p217_p2), 261120   ;;  %vm495_vm1 = vcmask (!%p217_p2), 523264  }
   0x6   : > { %220 = sbr.rel (%p217_p2) target bundleno = 245 (0xf5), region = 40  ;;  %v670_v1 = vld [vmem:[%s804_s2] sm:$0xff] (!%p217_p2)   ;;  %p252_p3 = scmp.lt.s32.totalorder (!%p217_p2), %s599_s25, 15  ;;  %637 = vmatprep.subr.bf16.mxu0 (!%p217_p2), %v669_v0  ;;  %v672_v3 = vld [vmem:[%s804_s2 + $0x8] sm:$0xff] (!%p217_p2)  }
   0x7   : > { %649 = vmatprep.subr.bf16.mxu1 (!%p217_p2), %v670_v1  ;;  %638 = vmatpush3.bf16.msra.mxu0 (!%p217_p2), %v669_v0  ;;  %v605_v8 = vld [vmem:[%s805_s3] ss:$0 sm:$0xff] (!%p217_p2) }
   0x8   : > { %650 = vmatpush3.bf16.msra.mxu1 (!%p217_p2), %v670_v1  ;;  %639 = vmatprep.subr.bf16.mxu0 (!%p217_p2), %v671_v2  ;;  %v616_v9 = vld [vmem:[%s806_s4] ss:$0 sm:$0xff] (!%p217_p2) }
   0x9   : > { %651 = vmatprep.subr.bf16.mxu1 (!%p217_p2), %v672_v3 }
   0xb   : > { %640 = vmatpush3.bf16.msra.mxu0 (!%p217_p2), %v671_v2 }
   0xc   : > { %652 = vmatpush3.bf16.msra.mxu1 (!%p217_p2), %v672_v3 }
   0xd   : > { %s810_s25 = smov (!%p252_p3, %s599_s25), 15 }
   0xe   : > { %s600_s8 = sshll.u32 %s810_s25, 2  ;;  %s602_s12 = sshll.u32 %s810_s25, 3 }
   0xf   : > { %s255_s11 = scalar_lea.vmem %s802_s0, %s600_s8  ;;  %s760_s19 = scalar_lea.vmem %s807_s5, %s602_s12 }
  0x10   : > { %v673_v4 = vld [vmem:[%s255_s11] sm:$0xff]   ;;  %v674_v5 = vld [vmem:[%s255_s11 + $0x8] sm:$0xff]   ;;  %v675_v6 = vld [vmem:[%s255_s11 + $0x10] sm:$0xff]   ;;  %s765_s23 = scalar_lea.vmem %s808_s6, %s602_s12 }
  0x11   : > { %641 = vmatprep.mubr.msk.bf16.mxu0 %vm325_vm0, %v673_v4  ;;  %653 = vmatprep.mubr.msk.bf16.mxu1 %vm325_vm0, %v673_v4  ;;  %v676_v7 = vld [vmem:[%s255_s11 + $0x18] sm:$0xff]  }
  0x12   : > { %642 = vmatmul.mubr.msk.bf16.vlgmr.msra.gmra.mrb[0].mxu0 %vm325_vm0, %v674_v5  ;;  %654 = vmatmul.mubr.msk.bf16.vlgmr.msra.gmra.mrb[0].mxu1 %vm325_vm0, %v674_v5 }
  0x13   : > { %645 = vmatprep.mubr.msk.bf16.mxu0 %vm325_vm0, %v675_v6  ;;  %657 = vmatprep.mubr.msk.bf16.mxu1 %vm325_vm0, %v675_v6 }
  0x1a   : > { %646 = vmatmul.mubr.msk.bf16.gmra.mrb[4].mxu0 %vm325_vm0, %v676_v7  ;;  %658 = vmatmul.mubr.msk.bf16.gmra.mrb[4].mxu1 %vm325_vm0, %v676_v7 }
  0xe5   : > { %v643_v10 = vpop.f32.mrb[0].mxu0  ;;  %v655_v12 = vpop.f32.mrb[0].mxu1 }
  0xe6   : > { %v381_v11 = vadd.f32 %v643_v10, %v605_v8  ;;  %v372_v13 = vpop.f32.mrb[1].mxu0  ;;  %v473_v14 = vadd.f32 %v655_v12, %v616_v9  ;;  %v464_v16 = vpop.f32.mrb[1].mxu1 }
  0xe7   : > { %v373_v15 = vadd.f32 %v605_v8, %v372_v13  ;;  %v644_v17 = vpop.f32.mrb[2].mxu0  ;;  %v465_v18 = vadd.f32 %v616_v9, %v464_v16  ;;  %v656_v20 = vpop.f32.mrb[2].mxu1 }
  0xe8   : > { %405 = vst.msk [vmem:[%s760_s19 + $0x10] sm:$0xff] %vm325_vm0, %v381_v11  ;;  %v384_v19 = vadd.f32 %v644_v17, %v605_v8  ;;  %v375_v21 = vpop.f32.mrb[3].mxu0  ;;  %v476_v22 = vadd.f32 %v656_v20, %v616_v9  ;;  %v467_v24 = vpop.f32.mrb[3].mxu1 }
  0xe9   : > { %498 = vst.msk [vmem:[%s765_s23 + $0x10] sm:$0xff] %vm495_vm1, %v473_v14  ;;  %v376_v23 = vadd.f32 %v605_v8, %v375_v21  ;;  %496 = vst.msk [vmem:[%s765_s23] sm:$0xff] %vm495_vm1, %v465_v18  ;;  %v468_v25 = vadd.f32 %v616_v9, %v467_v24 }
  0xea   : > { %403 = vst.msk [vmem:[%s760_s19] sm:$0xff] %vm325_vm0, %v373_v15  ;;  %406 = vst.msk [vmem:[%s760_s19 + $0x18] sm:$0xff] %vm325_vm0, %v384_v19 }
  0xeb   : > { %499 = vst.msk [vmem:[%s765_s23 + $0x18] sm:$0xff] %vm495_vm1, %v476_v22  ;;  %497 = vst.msk [vmem:[%s765_s23 + $0x8] sm:$0xff] %vm495_vm1, %v468_v25 }
  0xec   : > { %404 = vst.msk [vmem:[%s760_s19 + $0x8] sm:$0xff] %vm325_vm0, %v376_v23 }
  0xed   : > { %v647_v26 = vpop.f32.mrb[4].mxu0  ;;  %v659_v28 = vpop.f32.mrb[4].mxu1 }
  0xee   : > { %v397_v27 = vadd.f32 %v647_v26, %v605_v8  ;;  %v388_v29 = vpop.f32.mrb[5].mxu0  ;;  %v489_v30 = vadd.f32 %v659_v28, %v616_v9  ;;  %v480_v32 = vpop.f32.mrb[5].mxu1 }
  0xef   : > { %v389_v31 = vadd.f32 %v605_v8, %v388_v29  ;;  %v648_v33 = vpop.f32.mrb[6].mxu0  ;;  %v481_v34 = vadd.f32 %v616_v9, %v480_v32  ;;  %v660_v36 = vpop.f32.mrb[6].mxu1 }
  0xf0   : > { %409 = vst.msk [vmem:[%s760_s19 + $0x30] sm:$0xff] %vm325_vm0, %v397_v27  ;;  %v400_v35 = vadd.f32 %v648_v33, %v605_v8  ;;  %v391_v37 = vpop.f32.mrb[7].mxu0  ;;  %v492_v38 = vadd.f32 %v660_v36, %v616_v9  ;;  %v483_v40 = vpop.f32.mrb[7].mxu1 }
  0xf1   : > { %502 = vst.msk [vmem:[%s765_s23 + $0x30] sm:$0xff] %vm495_vm1, %v489_v30  ;;  %v392_v39 = vadd.f32 %v605_v8, %v391_v37  ;;  %500 = vst.msk [vmem:[%s765_s23 + $0x20] sm:$0xff] %vm495_vm1, %v481_v34  ;;  %v484_v41 = vadd.f32 %v616_v9, %v483_v40 }
  0xf2   : > { %407 = vst.msk [vmem:[%s760_s19 + $0x20] sm:$0xff] %vm325_vm0, %v389_v31  ;;  %410 = vst.msk [vmem:[%s760_s19 + $0x38] sm:$0xff] %vm325_vm0, %v400_v35 }
  0xf3   : > { %503 = vst.msk [vmem:[%s765_s23 + $0x38] sm:$0xff] %vm495_vm1, %v492_v38  ;;  %501 = vst.msk [vmem:[%s765_s23 + $0x28] sm:$0xff] %vm495_vm1, %v484_v41 }
  0xf4   : > { %408 = vst.msk [vmem:[%s760_s19 + $0x28] sm:$0xff] %vm325_vm0, %v392_v39 }
  0xf5 PF: > { %s17_s21 = sadd.s32 1, %s683_s21  }
  0xf6   : > { %p14_p4 = scmp.ge.s32.totalorder %s17_s21, 4  }
  0xf8   :  { %16 = sbr.rel (!%p14_p4) target bundleno = 1 (0x1), region = 82 }

</bundles_post_ra>
